<compile_context>
chip_gen: v7x
topology: tpu7x:2x2x1
jax: 0.10.0
libtpu: 0.0.40
codegen_flags: <defaults>
</compile_context>

<pallas_src>
import jax
import jax.numpy as jnp
from jax.experimental import pallas as pl
from jax.experimental.pallas import tpu as pltpu


def resfc_kernel(x_ref, w1_ref, b1_ref, w2_ref, b2_ref, out_ref):
    x = x_ref[...]                                                    # (tm, D) f32

    # fc1: Linear -> (norm_type=None) -> ReLU
    h = jnp.dot(x.astype(jnp.bfloat16), w1_ref[...],
                preferred_element_type=jnp.float32) + b1_ref[...]
    h = jnp.maximum(h, 0.0)

    # fc2: Linear -> (norm_type=None), no activation inside the block
    h = jnp.dot(h.astype(jnp.bfloat16), w2_ref[...],
                preferred_element_type=jnp.float32) + b2_ref[...]

    # residual add AFTER fc2, then the final activation (ResFCBlock.forward)
    out_ref[...] = jnp.maximum(h + x, 0.0).astype(out_ref.dtype)


def resfc_forward(x, w1_t, b1, w2_t, b2, *, tm=128):
    """ResFCBlock forward.

    x:    (B, D) float32 — B rows, D = in_channels (multiple of 128 for lane density)
    w*_t: (D, D) bfloat16 — PyTorch Linear weight transposed to (in, out)
    b*:   (1, D) float32
    """
    B, D = x.shape
    tm = min(tm, B)
    assert B % tm == 0, "batch must be a multiple of the row tile"
    grid = (B // tm,)

    row_spec = pl.BlockSpec((tm, D), lambda i: (i, 0))       # tiled over rows
    w_spec = pl.BlockSpec((D, D), lambda i: (0, 0))          # resident across grid steps
    b_spec = pl.BlockSpec((1, D), lambda i: (0, 0))          # resident across grid steps

    return pl.pallas_call(
        resfc_kernel,
        out_shape=jax.ShapeDtypeStruct((B, D), x.dtype),
        grid=grid,
        in_specs=[row_spec, w_spec, b_spec, w_spec, b_spec],
        out_specs=row_spec,
        compiler_params=pltpu.CompilerParams(
            dimension_semantics=("parallel",),
            vmem_limit_bytes=32 * 1024 * 1024,
        ),
    )(x, w1_t, b1, w2_t, b2)


def _reference(x, w1_t, b1, w2_t, b2):
    """Pure-JAX reference of ResFCBlock.forward (activation='relu', norm_type=None),
    using the same bf16-operand / f32-accumulate matmul path as the kernel."""
    h = jnp.dot(x.astype(jnp.bfloat16), w1_t,
                preferred_element_type=jnp.float32) + b1
    h = jnp.maximum(h, 0.0)
    h = jnp.dot(h.astype(jnp.bfloat16), w2_t,
                preferred_element_type=jnp.float32) + b2
    return jnp.maximum(h + x, 0.0)


# TODO(synk): norm_type is None by default in ResFCBlock; the optional LN/BN
# variants of fc_block are not implemented in this kernel.

if __name__ == "__main__":
    B, D = 256, 128   # rows amortize launch/DMA; D multiple of 128 -> lane-dense

    key = jax.random.PRNGKey(0)
    k0, k1, k2, k3, k4 = jax.random.split(key, 5)

    x = jax.random.normal(k0, (B, D), jnp.float32)

    # PyTorch nn.Linear stores weight as (out, in) and computes x @ W.T + b.
    # We pass W.T (shape (in, out)) directly, stored as bf16; biases stay f32.
    scale = 1.0 / jnp.sqrt(jnp.float32(D))
    w1_t = (jax.random.normal(k1, (D, D), jnp.float32) * scale).astype(jnp.bfloat16)
    b1 = jax.random.normal(k2, (1, D), jnp.float32) * 0.1
    w2_t = (jax.random.normal(k3, (D, D), jnp.float32) * scale).astype(jnp.bfloat16)
    b2 = jax.random.normal(k4, (1, D), jnp.float32) * 0.1

    out = jax.block_until_ready(resfc_forward(x, w1_t, b1, w2_t, b2))
    ref = jax.block_until_ready(_reference(x, w1_t, b1, w2_t, b2))

    assert out.shape == (B, D)
    assert jnp.allclose(out, ref, atol=1e-3, rtol=1e-3), (
        float(jnp.max(jnp.abs(out - ref))))
    print("KERNEL_OK")
</pallas_src>

<mosaic_0001>
module attributes {stable_mosaic.version = 11 : i64} {
  func.func @resfc_kernel(%arg0: i32, %arg1: memref<128x128xf32, #tpu.memory_space<vmem>>, %arg2: memref<128x128xbf16, #tpu.memory_space<vmem>>, %arg3: memref<1x128xf32, #tpu.memory_space<vmem>>, %arg4: memref<128x128xbf16, #tpu.memory_space<vmem>>, %arg5: memref<1x128xf32, #tpu.memory_space<vmem>>, %arg6: memref<128x128xf32, #tpu.memory_space<vmem>>) attributes {dimension_semantics = [#tpu.dimension_semantics<parallel>], iteration_bounds = array<i64: 2>, scalar_prefetch = 0 : i64, scratch_operands = 0 : i64, tpu.core_type = #tpu.core_type<tc>, window_params = [{transform_indices = @transform_0, window_bounds = array<i64: 128, 128>}, {pipeline_mode = #tpu.pipeline_mode<synchronous>, transform_indices = @transform_1, window_bounds = array<i64: 128, 128>}, {pipeline_mode = #tpu.pipeline_mode<synchronous>, transform_indices = @transform_2, window_bounds = array<i64: 1, 128>}, {pipeline_mode = #tpu.pipeline_mode<synchronous>, transform_indices = @transform_3, window_bounds = array<i64: 128, 128>}, {pipeline_mode = #tpu.pipeline_mode<synchronous>, transform_indices = @transform_4, window_bounds = array<i64: 1, 128>}, {transform_indices = @transform_5, window_bounds = array<i64: 128, 128>}]} {
    %c0 = arith.constant 0 : index
    %c0_0 = arith.constant 0 : index
    %0 = vector.load %arg1[%c0, %c0_0] : memref<128x128xf32, #tpu.memory_space<vmem>>, vector<128x128xf32>
    %1 = arith.truncf %0 : vector<128x128xf32> to vector<128x128xbf16>
    %c0_1 = arith.constant 0 : index
    %c0_2 = arith.constant 0 : index
    %2 = vector.load %arg2[%c0_1, %c0_2] : memref<128x128xbf16, #tpu.memory_space<vmem>>, vector<128x128xbf16>
    %cst = arith.constant dense<0.000000e+00> : vector<128x128xf32>
    %3 = tpu.matmul %1, %2, %cst {dimension_numbers = #tpu.dot_dimension_numbers<[1], [0], [0], [1], [0, 0, 1, 1], [], []>} : vector<128x128xbf16>, vector<128x128xbf16>, vector<128x128xf32> -> vector<128x128xf32>
    %c0_3 = arith.constant 0 : index
    %c0_4 = arith.constant 0 : index
    %4 = vector.load %arg3[%c0_3, %c0_4] : memref<1x128xf32, #tpu.memory_space<vmem>>, vector<1x128xf32>
    %5 = vector.broadcast %4 : vector<1x128xf32> to vector<128x128xf32>
    %6 = arith.addf %3, %5 : vector<128x128xf32>
    %cst_5 = arith.constant 0.000000e+00 : f32
    %7 = vector.broadcast %cst_5 : f32 to vector<128x128xf32>
    %8 = arith.maximumf %6, %7 : vector<128x128xf32>
    %9 = arith.truncf %8 : vector<128x128xf32> to vector<128x128xbf16>
    %c0_6 = arith.constant 0 : index
    %c0_7 = arith.constant 0 : index
    %10 = vector.load %arg4[%c0_6, %c0_7] : memref<128x128xbf16, #tpu.memory_space<vmem>>, vector<128x128xbf16>
    %cst_8 = arith.constant dense<0.000000e+00> : vector<128x128xf32>
    %11 = tpu.matmul %9, %10, %cst_8 {dimension_numbers = #tpu.dot_dimension_numbers<[1], [0], [0], [1], [0, 0, 1, 1], [], []>} : vector<128x128xbf16>, vector<128x128xbf16>, vector<128x128xf32> -> vector<128x128xf32>
    %c0_9 = arith.constant 0 : index
    %c0_10 = arith.constant 0 : index
    %12 = vector.load %arg5[%c0_9, %c0_10] : memref<1x128xf32, #tpu.memory_space<vmem>>, vector<1x128xf32>
    %13 = vector.broadcast %12 : vector<1x128xf32> to vector<128x128xf32>
    %14 = arith.addf %11, %13 : vector<128x128xf32>
    %15 = arith.addf %14, %0 : vector<128x128xf32>
    %cst_11 = arith.constant 0.000000e+00 : f32
    %16 = vector.broadcast %cst_11 : f32 to vector<128x128xf32>
    %17 = arith.maximumf %15, %16 : vector<128x128xf32>
    %c0_12 = arith.constant 0 : index
    %c0_13 = arith.constant 0 : index
    %18 = vector.load %arg6[%c0_12, %c0_13] : memref<128x128xf32, #tpu.memory_space<vmem>>, vector<128x128xf32>
    tpu.vector_store %arg6[%c0_12, %c0_13], %17 {strides = array<i32>} : memref<128x128xf32, #tpu.memory_space<vmem>>, vector<128x128xf32>,
    return
  }
  func.func @transform_0(%arg0: i32) -> (i32, i32) {
    %c0_i32 = arith.constant 0 : i32
    %c0_i32_0 = arith.constant 0 : i32
    return %arg0, %c0_i32 : i32, i32
  }
  func.func @transform_1(%arg0: i32) -> (i32, i32) {
    %c0_i32 = arith.constant 0 : i32
    %c0_i32_0 = arith.constant 0 : i32
    %c0_i32_1 = arith.constant 0 : i32
    return %c0_i32, %c0_i32_0 : i32, i32
  }
  func.func @transform_2(%arg0: i32) -> (i32, i32) {
    %c0_i32 = arith.constant 0 : i32
    %c0_i32_0 = arith.constant 0 : i32
    %c0_i32_1 = arith.constant 0 : i32
    return %c0_i32, %c0_i32_0 : i32, i32
  }
  func.func @transform_3(%arg0: i32) -> (i32, i32) {
    %c0_i32 = arith.constant 0 : i32
    %c0_i32_0 = arith.constant 0 : i32
    %c0_i32_1 = arith.constant 0 : i32
    return %c0_i32, %c0_i32_0 : i32, i32
  }
  func.func @transform_4(%arg0: i32) -> (i32, i32) {
    %c0_i32 = arith.constant 0 : i32
    %c0_i32_0 = arith.constant 0 : i32
    %c0_i32_1 = arith.constant 0 : i32
    return %c0_i32, %c0_i32_0 : i32, i32
  }
  func.func @transform_5(%arg0: i32) -> (i32, i32) {
    %c0_i32 = arith.constant 0 : i32
    %c0_i32_0 = arith.constant 0 : i32
    return %arg0, %c0_i32 : i32, i32
  }
}

</mosaic_0001>

<bundles_post_ra>
// kernel: tpu_custom_call.1
= control target key start
LH: loop header
LB: loop body
LE: loop exit
PB: predicated region body
PF: predicated region fallthrough
CT: control target
= control target key end

     0   :  { %10 = vsyncpa [#allocation3], 0  ;;  %s1597_s0 = inlined_call_operand.hbm [shape: f32[256,128], index: 0, kind: input, shape index: {}]   ;;  %s1598_s1 = inlined_call_operand.hbm [shape: bf16[128,128], index: 1, kind: input, shape index: {}]   ;;  %s1599_s2 = inlined_call_operand.vmem [shape: f32[1,128], index: 2, kind: input, shape index: {}]   ;;  %s1600_s3 = inlined_call_operand.hbm [shape: bf16[128,128], index: 3, kind: input, shape index: {}]   ;;  %s1601_s4 = inlined_call_operand.vmem [shape: f32[1,128], index: 4, kind: input, shape index: {}]   ;;  %s1602_s5 = inlined_call_operand.hbm [shape: f32[256,128], index: 5, kind: output, shape index: {}]  }
   0x1   :  { %12 = vsyncpa [#allocation3 + $0x1], 0 }
   0x2   :  { %13 = vsyncpa [#allocation6], 0 }
   0x3   :  { %14 = vsyncpa [#allocation4], 0 }
   0x4   :  { %16 = vsyncpa [#allocation4 + $0x1], 0  ;;  %s1234_s18 = smov 0   ;;  %s1236_s19 = smov 0  }
   0x5   :  { %s1238_s20 = smov 0   ;;  %s1240_s21 = smov 0  }
   0x6 LB: > { %s1255_s22 = sadd.s32 4294967295, %s1192_s21   ;;  %s813_s23 = sadd.s32 4294967294, %s1192_s21   ;;  %s1192_s21 = sphi %s1240_s21, %s1622_s21   ;;  %s1188_s20 = sphi %s1238_s20, %s1621_s20   ;;  %s1184_s19 = sphi %s1236_s19, %s1620_s19   ;;  %s1180_s18 = sphi %s1234_s18, %s1619_s18  }
   0x7   : > { %p42_p0 = scmp.ne.s32.totalorder %s1184_s19, %s1180_s18  ;;  %p1603_p1 = scmp.eq.s32.totalorder %s1255_s22, 0 }
   0x8   : > { %p156_p3 = scmp.eq.s32.totalorder %s813_s23, 1  ;;  %p814_p5 = scmp.ge.s32.totalorder %s1192_s21, 1 }
   0x9   : > { %p1264_p4 = por %p1603_p1, %p42_p0  ;;  %p163_p7 = scmp.lt.s32.totalorder %s1192_s21, 3 }
   0xa   : > { %p1269_p6 = por %p156_p3, %p42_p0  ;;  %s1194_s27 = smov [#allocation5]  }
   0xb   : > { %s1606_s24 = scalar_select %p1264_p4, 1, 0 }
   0xc   : > { %s1607_s25 = scalar_select %p1269_p6, 1, 0 }
   0xd   : > { %p1274_p8 = pnand %p814_p5, %p163_p7  ;;  %s175_s28 = sshll.u32 %s1194_s27, 4  ;;  %s1278_s28 = int_to_ptr.vmem [resolvable:$true] %s175_s28 }
   0xe   : > { %s1195_s30 = smov [#allocation7]   ;;  %s1036_s9 = scalar_lea.hbm %s1598_s1, 1024 }
   0xf   : > { %p959_p9 = pneg %p1274_p8  ;;  %s191_s6 = sshll.u32 %s1195_s30, 4  ;;  %s1289_s6 = int_to_ptr.vmem [resolvable:$true] %s191_s6 }
  0x10   : > { %p1037_p12 = scmp.ne.s32.totalorder %s1598_s1, %s1036_s9  ;;  %p1043_p5 = scmp.lt.u32.totalorder %s1036_s9, %s1598_s1 }
  0x11   : > { %p1285_p11 = pnand %p959_p9, %p1603_p1 }
  0x13   : > { %p1038_p13 = pneg %p1285_p11 }
  0x15   : > { %p1039_p0 = pnand %p1038_p13, %p1037_p12 }
  0x17   : > { %p1040_p3 = pneg %p1039_p0 }
  0x19   : > { %p1045_p7 = pnand %p1043_p5, %p1040_p3 }
  0x1b   : > { %1048 = shalt.err (!%p1045_p7)
}
  0x1c   : > { %s1049_s14 = scalar_lea.vmem %s1278_s28, 1024  ;;  %p1057_p2 = scmp.lt.s32.totalorder %s1278_s28, %s1278_s28 }
  0x1d   : > { %p1050_p9 = scmp.ne.s32.totalorder %s1278_s28, %s1049_s14  ;;  %p1058_p12 = scmp.lt.s32.totalorder %s1049_s14, %s1049_s14 }
  0x1f   : > { %p1052_p10 = pnand %p1050_p9, %p1038_p13  ;;  %p1059_p0 = por %p1058_p12, %p1057_p2 }
  0x21   : > { %p1053_p1 = pneg %p1052_p10 }
  0x23   : > { %p1060_p6 = pnand %p1059_p0, %p1053_p1 }
  0x25   : > { %1063 = shalt.err (!%p1060_p6)
}
  0x26   : > { %s1196_s15 = smov 64   ;;  %s1197_s16 = smov 4  }
  0x27   : > { %962 = dma.hbm_to_vmem [thread:$0]  (!%p1285_p11), %s1598_s1, 1024, %s1278_s28, [#allocation6], %s1196_s15, %s1196_s15, %s1197_s16  }
  0x28   : > { %s1064_s7 = scalar_lea.hbm %s1600_s3, 1024 }
  0x29   : > { %p1065_p2 = scmp.ne.s32.totalorder %s1600_s3, %s1064_s7  ;;  %p1071_p10 = scmp.lt.u32.totalorder %s1064_s7, %s1600_s3 }
  0x2b   : > { %p1067_p1 = pnand %p1065_p2, %p1038_p13 }
  0x2d   : > { %p1068_p6 = pneg %p1067_p1 }
  0x2f   : > { %p1073_p3 = pnand %p1071_p10, %p1068_p6 }
  0x31   : > { %1076 = shalt.err (!%p1073_p3)
}
  0x32   : > { %s1077_s28 = scalar_lea.vmem %s1289_s6, 1024  ;;  %p1085_p12 = scmp.lt.s32.totalorder %s1289_s6, %s1289_s6 }
  0x33   : > { %p1078_p5 = scmp.ne.s32.totalorder %s1289_s6, %s1077_s28  ;;  %p1086_p0 = scmp.lt.s32.totalorder %s1077_s28, %s1077_s28 }
  0x35   : > { %p1080_p7 = pnand %p1078_p5, %p1038_p13  ;;  %p1087_p2 = por %p1086_p0, %p1085_p12 }
  0x37   : > { %p1081_p9 = pneg %p1080_p7 }
  0x39   : > { %p1088_p1 = pnand %p1087_p2, %p1081_p9 }
  0x3b   : > { %1091 = shalt.err (!%p1088_p1)
}
  0x3c   : > { %965 = dma.hbm_to_vmem [thread:$0]  (!%p1285_p11), %s1600_s3, 1024, %s1289_s6, [#allocation6], %s1196_s15, %s1196_s15, %s1197_s16  }
  0x3d   : > { %s1344_s14 = sadd.s32 1, %s1192_s21   ;;  %s29_s29 = sadd.s32 1, %s1188_s20 }
  0x3e   : > { %s26_s17 = ssub.s32 %s1192_s21, %s1344_s14  ;;  %p36_p13 = scmp.ne.s32.totalorder %s1188_s20, %s1184_s19 }
  0x3f   : > { %p27_p6 = scmp.eq.s32.totalorder %s26_s17, 0  ;;  %p37_p10 = scmp.eq.s32.totalorder %s1192_s21, 0 }
  0x40   : > { %p1610_p3 = scmp.eq.s32.totalorder %s1255_s22, 1  ;;  %p976_p7 = scmp.lt.s32.totalorder %s1192_s21, 2 }
  0x41   : > { %s1360_s27 = scalar_select %p27_p6, %s1188_s20, %s29_s29  }
  0x42   : > { %p1354_p5 = por %p1610_p3, %p36_p13  ;;  %p38_p9 = por %p37_p10, %p36_p13 }
  0x43   : > { %s208_s30 = sand.u32 1, %s1188_s20   ;;  %s849_s6 = sshll.u32 %s1192_s21, 11 }
  0x44   : > { %s1611_s23 = scalar_select %p1354_p5, 1, 0 }
  0x45   : > { %s818_s7 = sshll.u32 %s208_s30, 7  ;;  %s1367_s8 = scalar_lea.hbm %s1597_s0, %s849_s6 }
  0x46   : > { %s212_s9 = scalar_lea.vmem [#allocation2], %s818_s7  ;;  %p1371_p11 = pnand %p976_p7, %p38_p9 }
  0x47   : > { %s219_s10 = sshll.u32 %s212_s9, 4  ;;  %s1375_s28 = scalar_lea.sflag [#allocation3], %s208_s30  ;;  %s1369_s10 = int_to_ptr.vmem [resolvable:$true] %s219_s10 }
  0x48   : > { %s1092_s12 = scalar_lea.hbm %s1367_s8, 2048  ;;  %p1094_p0 = pneg %p1371_p11 }
  0x49   : > { %p1093_p12 = scmp.ne.s32.totalorder %s1367_s8, %s1092_s12  ;;  %s1097_s17 = scalar_lea.hbm %s1597_s0, 4096 }
  0x4a   : > { %p1098_p13 = scmp.lt.u32.totalorder %s1367_s8, %s1597_s0  ;;  %p1099_p6 = scmp.lt.u32.totalorder %s1097_s17, %s1092_s12 }
  0x4b   : > { %p1095_p2 = pnand %p1094_p0, %p1093_p12  ;;  %p1101_p3 = scmp.lt.u32.totalorder %s1092_s12, %s1367_s8 }
  0x4c   : > { %p1100_p10 = por %p1099_p6, %p1098_p13 }
  0x4d   : > { %p1096_p1 = pneg %p1095_p2 }
  0x4e   : > { %p1102_p7 = por %p1101_p3, %p1100_p10 }
  0x50   : > { %p1103_p9 = pnand %p1102_p7, %p1096_p1 }
  0x52   : > { %1106 = shalt.err (!%p1103_p9)
}
  0x53   : > { %s1107_s30 = scalar_lea.vmem %s1369_s10, 2048  ;;  %s1198_s15 = smov [#allocation2]  }
  0x54   : > { %p1108_p12 = scmp.ne.s32.totalorder %s1369_s10, %s1107_s30  ;;  %s1112_s16 = sshll.u32 %s1198_s15, 4  ;;  %s1113_s16 = int_to_ptr.vmem [resolvable:$false] %s1112_s16 }
  0x55   : > { %s1114_s9 = scalar_lea.vmem %s1113_s16, 4096  ;;  %p1115_p4 = scmp.lt.s32.totalorder %s1369_s10, %s1113_s16 }
  0x56   : > { %p1110_p2 = pnand %p1108_p12, %p1094_p0  ;;  %p1116_p13 = scmp.lt.s32.totalorder %s1114_s9, %s1107_s30 }
  0x58   : > { %p1111_p5 = pneg %p1110_p2  ;;  %p1117_p6 = por %p1116_p13, %p1115_p4 }
  0x5a   : > { %p1118_p10 = pnand %p1117_p6, %p1111_p5 }
  0x5c   : > { %1121 = shalt.err (!%p1118_p10)
}
  0x5d   : > { %s1199_s12 = smov 128   ;;  %s1200_s13 = smov 8  }
  0x5e   : > { %969 = dma.hbm_to_vmem [thread:$0]  (!%p1371_p11), %s1367_s8, 2048, %s1369_s10, %s1375_s28, %s1199_s12, %s1199_s12, %s1200_s13  }
  0x5f   : > { %231 = sbr.rel (%p1274_p8) target bundleno = 621 (0x26d), region = 40  ;;  %s1406_s29 = sand.u32 (!%p1274_p8), 1, %s1184_s19  }
  0x60   : > { %s822_s17 = sshll.u32 (!%p1274_p8), %s1406_s29, 7  ;;  %s234_s7 = scalar_lea.sflag (!%p1274_p8), [#allocation3], %s1406_s29 }
  0x61   : > { %s1412_s6 = scalar_lea.vmem (!%p1274_p8), [#allocation2], %s822_s17  ;;  %p1613_p4 = scmp.ne.s32.totalorder (!%p1274_p8), %s1606_s24, 0 }
  0x66   : > { %1167 = dma.done.wait (%p1613_p4), %s234_s7, 2048  }
  0x67   : > { %1169 = vsyncadd (%p1613_p4), %s234_s7, 4294965248  ;;  %p1614_p5 = scmp.eq.s32.totalorder %s1255_s22, 0 }
  0x69   : > { %1171 = dma.done.wait (%p1614_p5), [#allocation6], 2048   ;;  %p1615_p8 = pmov %p1614_p5 }
  0x6a   : > { %v1020_v0 = vld [vmem:[#allocation5] sm:$0xff]   ;;  %v1021_v1 = vld [vmem:[#allocation5 + $0x8] sm:$0xff]   ;;  %v1022_v2 = vld [vmem:[#allocation5 + $0x10] sm:$0xff]   ;;  %s1504_s11 = scalar_lea.vmem [#allocation8], %s822_s17  ;;  %s850_s28 = sshll.u32 %s1255_s22, 11 }
  0x6b   : > { %1173 = vsyncadd (%p1615_p8), [#allocation6], 4294965248  ;;  %883 = vmatprep.subr.bf16.mxu0 %v1020_v0  ;;  %v1023_v3 = vld [vmem:[#allocation5 + $0x18] sm:$0xff]   ;;  %v1423_v4 = vld [vmem:[%s1412_s6] sm:$0xff]  ;;  %s721_s30 = sshll.u32 %s1504_s11, 4  ;;  %s1548_s9 = scalar_lea.hbm %s1602_s5, %s850_s28  ;;  %s1550_s30 = int_to_ptr.vmem [resolvable:$true] %s721_s30 }
  0x6c   : > { %884 = vmatpush3.bf16.msra.mxu0 %v1020_v0  ;;  %v1426_v5 = vld [vmem:[%s1412_s6 + $0x8] sm:$0xff]  ;;  %v1024_v7 = vld [vmem:[#allocation5 + $0x20] sm:$0xff]   ;;  %v1030_v11 = vld [vmem:[#allocation7 + $0x10] sm:$0xff]   ;;  %s708_s22 = scalar_lea.sflag [#allocation4], %s1406_s29  ;;  %s1122_s12 = scalar_lea.vmem %s1550_s30, 2048 }
  0x6d   : > { %885 = vmatprep.subr.bf16.mxu0 %v1021_v1  ;;  %v291_v6 = vpack.c.bf16 %v1426_v5, %v1423_v4  ;;  %v1028_v8 = vld [vmem:[#allocation7] sm:$0xff]   ;;  %v1029_v9 = vld [vmem:[#allocation7 + $0x8] sm:$0xff]   ;;  %v1026_v12 = vld [vmem:[#allocation5 + $0x30] sm:$0xff]   ;;  %p1123_p11 = scmp.ne.s32.totalorder %s1550_s30, %s1122_s12  ;;  %p1616_p0 = scmp.ne.s32.totalorder %s1611_s23, 0 }
  0x6e   : > { %v1025_v10 = vld [vmem:[#allocation5 + $0x28] sm:$0xff]   ;;  %915 = vmatprep.subr.bf16.mxu1 %v1028_v8  ;;  %v1031_v13 = vld [vmem:[#allocation7 + $0x18] sm:$0xff]   ;;  %v1032_v15 = vld [vmem:[#allocation7 + $0x20] sm:$0xff]   ;;  %s1201_s13 = smov [#allocation8]  }
  0x6f   : > { %899 = vmatprep.mubr.bf16.mxu0 %v291_v6  ;;  %916 = vmatpush3.bf16.msra.mxu1 %v1028_v8  ;;  %v1027_v14 = vld [vmem:[#allocation5 + $0x38] sm:$0xff]   ;;  %v1431_v16 = vld [vmem:[%s1412_s6 + $0x10] sm:$0xff]  ;;  %v1437_v18 = vld [vmem:[%s1412_s6 + $0x20] sm:$0xff]  ;;  %p1124_p1 = pnand %p1123_p11, %p1616_p0  ;;  %s1126_s17 = sshll.u32 %s1201_s13, 4  ;;  %s1127_s17 = int_to_ptr.vmem [resolvable:$false] %s1126_s17 }
  0x70   : > { %886 = vmatpush3.bf16.msra.mxu0 %v1021_v1  ;;  %917 = vmatprep.subr.bf16.mxu1 %v1029_v9  ;;  %v1434_v17 = vld [vmem:[%s1412_s6 + $0x18] sm:$0xff]  ;;  %v1440_v19 = vld [vmem:[%s1412_s6 + $0x28] sm:$0xff]  ;;  %v1447_v23 = vld [vmem:[%s1412_s6 + $0x30] sm:$0xff]  ;;  %s1128_s7 = scalar_lea.vmem %s1127_s17, 4096  ;;  %p1129_p7 = scmp.lt.s32.totalorder %s1550_s30, %s1127_s17 }
  0x71   : > { %887 = vmatprep.subr.bf16.mxu0 %v1022_v2  ;;  %v292_v20 = vpack.c.bf16 %v1434_v17, %v1431_v16  ;;  %v1033_v21 = vld [vmem:[#allocation7 + $0x28] sm:$0xff]   ;;  %v293_v22 = vpack.c.bf16 %v1440_v19, %v1437_v18  ;;  %v1450_v24 = vld [vmem:[%s1412_s6 + $0x38] sm:$0xff]  ;;  %v1453_v25 = vld [vmem:[%s1412_s6 + $0x40] sm:$0xff]  ;;  %p1125_p3 = pneg %p1124_p1  ;;  %p1130_p9 = scmp.lt.s32.totalorder %s1128_s7, %s1122_s12 }
  0x72   : > { %v1456_v26 = vld [vmem:[%s1412_s6 + $0x48] sm:$0xff]  ;;  %v294_v27 = vpack.c.bf16 %v1450_v24, %v1447_v23  ;;  %v1463_v29 = vld [vmem:[%s1412_s6 + $0x50] sm:$0xff]  ;;  %v1466_v30 = vld [vmem:[%s1412_s6 + $0x58] sm:$0xff] }
  0x73   : > { %918 = vmatpush3.bf16.msra.mxu1 %v1029_v9  ;;  %v295_v28 = vpack.c.bf16 %v1456_v26, %v1453_v25  ;;  %v1469_v31 = vld [vmem:[%s1412_s6 + $0x60] sm:$0xff]  ;;  %v1472_v32 = vld [vmem:[%s1412_s6 + $0x68] sm:$0xff]  ;;  %v296_v33 = vpack.c.bf16 %v1466_v30, %v1463_v29  ;;  %v1479_v35 = vld [vmem:[%s1412_s6 + $0x70] sm:$0xff]  ;;  %p1131_p12 = por %p1130_p9, %p1129_p7 }
  0x74   : > { %888 = vmatpush3.bf16.msra.mxu0 %v1022_v2  ;;  %919 = vmatprep.subr.bf16.mxu1 %v1030_v11  ;;  %v297_v34 = vpack.c.bf16 %v1472_v32, %v1469_v31  ;;  %v1482_v36 = vld [vmem:[%s1412_s6 + $0x78] sm:$0xff]  ;;  %v1034_v38 = vld [vmem:[#allocation7 + $0x30] sm:$0xff]   ;;  %v826_v40 = vld [vmem:[%s1599_s2] ss:$0 sm:$0xff] }
  0x75   : > { %889 = vmatprep.subr.bf16.mxu0 %v1023_v3  ;;  %v298_v37 = vpack.c.bf16 %v1482_v36, %v1479_v35  ;;  %v1035_v39 = vld [vmem:[#allocation7 + $0x38] sm:$0xff]   ;;  %p1132_p2 = pnand %p1131_p12, %p1125_p3 }
  0x77   : > { %920 = vmatpush3.bf16.msra.mxu1 %v1030_v11 }
  0x78   : > { %890 = vmatpush3.bf16.msra.mxu0 %v1023_v3  ;;  %921 = vmatprep.subr.bf16.mxu1 %v1031_v13 }
  0x79   : > { %891 = vmatprep.subr.bf16.mxu0 %v1024_v7 }
  0x7b   : > { %922 = vmatpush3.bf16.msra.mxu1 %v1031_v13 }
  0x7c   : > { %892 = vmatpush3.bf16.msra.mxu0 %v1024_v7  ;;  %923 = vmatprep.subr.bf16.mxu1 %v1032_v15 }
  0x7d   : > { %893 = vmatprep.subr.bf16.mxu0 %v1025_v10 }
  0x7f   : > { %924 = vmatpush3.bf16.msra.mxu1 %v1032_v15 }
  0x80   : > { %894 = vmatpush3.bf16.msra.mxu0 %v1025_v10  ;;  %925 = vmatprep.subr.bf16.mxu1 %v1033_v21 }
  0x81   : > { %895 = vmatprep.subr.bf16.mxu0 %v1026_v12 }
  0x83   : > { %926 = vmatpush3.bf16.msra.mxu1 %v1033_v21 }
  0x84   : > { %896 = vmatpush3.bf16.msra.mxu0 %v1026_v12  ;;  %927 = vmatprep.subr.bf16.mxu1 %v1034_v38 }
  0x85   : > { %897 = vmatprep.subr.bf16.mxu0 %v1027_v14 }
  0x87   : > { %928 = vmatpush3.bf16.msra.mxu1 %v1034_v38 }
  0x88   : > { %898 = vmatpush3.bf16.msra.mxu0 %v1027_v14  ;;  %929 = vmatprep.subr.bf16.mxu1 %v1035_v39 }
  0x8b   : > { %900 = vmatmul.mubr.bf16.vlgmr.msra.gmra.mrb[0].mxu0 %v292_v20  ;;  %930 = vmatpush3.bf16.msra.mxu1 %v1035_v39 }
  0x8c   : > { %903 = vmatprep.mubr.bf16.mxu0 %v293_v22 }
  0x93   : > { %904 = vmatmul.mubr.bf16.gmra.mrb[4].mxu0 %v294_v27 }
  0x94   : > { %907 = vmatprep.mubr.bf16.mxu0 %v295_v28 }
  0x9b   : > { %908 = vmatmul.mubr.bf16.gmra.mrb[8].mxu0 %v296_v33 }
  0x9c   : > { %911 = vmatprep.mubr.bf16.mxu0 %v297_v34 }
  0xa3   : > { %912 = vmatmul.mubr.bf16.gmra.mrb[12].mxu0 %v298_v37 }
 0x15e   : > { %v901_v41 = vpop.f32.mrb[0].mxu0 }
 0x15f   : > { %v413_v42 = vadd.f32 %v901_v41, %v826_v40  ;;  %v404_v43 = vpop.f32.mrb[1].mxu0 }
 0x160   : > { %v405_v44 = vadd.f32 %v826_v40, %v404_v43  ;;  %v902_v45 = vpop.f32.mrb[2].mxu0 }
 0x161   : > { %v416_v46 = vadd.f32 %v902_v45, %v826_v40  ;;  %v407_v47 = vpop.f32.mrb[3].mxu0  ;;  %v469_v49 = vmax.f32 %v413_v42, 0.0 }
 0x162   : > { %v408_v48 = vadd.f32 %v826_v40, %v407_v47  ;;  %v467_v51 = vmax.f32 %v405_v44, 0.0 }
 0x163   : > { %v470_v50 = vmax.f32 %v416_v46, 0.0 }
 0x164   : > { %v468_v52 = vmax.f32 %v408_v48, 0.0 }
 0x165   : > { %v484_v53 = vpack.c.bf16 %v470_v50, %v469_v49  ;;  %v1492_v50 = vld [vmem:[%s1601_s4] ss:$0 sm:$0xff] }
 0x166   : > { %v905_v54 = vpop.f32.mrb[4].mxu0  ;;  %v483_v55 = vpack.c.bf16 %v468_v52, %v467_v51 }
 0x167   : > { %v429_v56 = vadd.f32 %v905_v54, %v826_v40  ;;  %v420_v57 = vpop.f32.mrb[5].mxu0 }
 0x168   : > { %v421_v58 = vadd.f32 %v826_v40, %v420_v57  ;;  %v906_v59 = vpop.f32.mrb[6].mxu0  ;;  %931 = vmatprep.mubr.bf16.mxu1 %v483_v55 }
 0x169   : > { %v432_v60 = vadd.f32 %v906_v59, %v826_v40  ;;  %v423_v61 = vpop.f32.mrb[7].mxu0  ;;  %932 = vmatmul.mubr.bf16.vlgmr.msra.gmra.mrb[0].mxu1 %v484_v53  ;;  %v473_v63 = vmax.f32 %v429_v56, 0.0 }
 0x16a   : > { %v424_v62 = vadd.f32 %v826_v40, %v423_v61  ;;  %v471_v1 = vmax.f32 %v421_v58, 0.0 }
 0x16b   : > { %v474_v0 = vmax.f32 %v432_v60, 0.0 }
 0x16c   : > { %v472_v2 = vmax.f32 %v424_v62, 0.0 }
 0x16d   : > { %v486_v3 = vpack.c.bf16 %v474_v0, %v473_v63 }
 0x16e   : > { %v485_v6 = vpack.c.bf16 %v472_v2, %v471_v1  ;;  %v909_v7 = vpop.f32.mrb[8].mxu0 }
 0x16f   : > { %v445_v8 = vadd.f32 %v909_v7, %v826_v40  ;;  %v436_v9 = vpop.f32.mrb[9].mxu0 }
 0x170   : > { %v437_v10 = vadd.f32 %v826_v40, %v436_v9  ;;  %v910_v11 = vpop.f32.mrb[10].mxu0  ;;  %935 = vmatprep.mubr.bf16.mxu1 %v485_v6 }
 0x171   : > { %v448_v12 = vadd.f32 %v910_v11, %v826_v40  ;;  %v439_v13 = vpop.f32.mrb[11].mxu0  ;;  %936 = vmatmul.mubr.bf16.gmra.mrb[4].mxu1 %v486_v3  ;;  %v477_v15 = vmax.f32 %v445_v8, 0.0 }
 0x172   : > { %v440_v14 = vadd.f32 %v826_v40, %v439_v13  ;;  %v475_v21 = vmax.f32 %v437_v10, 0.0 }
 0x173   : > { %v478_v20 = vmax.f32 %v448_v12, 0.0 }
 0x174   : > { %v476_v22 = vmax.f32 %v440_v14, 0.0 }
 0x175   : > { %v488_v27 = vpack.c.bf16 %v478_v20, %v477_v15 }
 0x176   : > { %v487_v28 = vpack.c.bf16 %v476_v22, %v475_v21  ;;  %v913_v33 = vpop.f32.mrb[12].mxu0 }
 0x177   : > { %v461_v34 = vadd.f32 %v913_v33, %v826_v40  ;;  %v452_v37 = vpop.f32.mrb[13].mxu0 }
 0x178   : > { %v453_v38 = vadd.f32 %v826_v40, %v452_v37  ;;  %v914_v39 = vpop.f32.mrb[14].mxu0  ;;  %939 = vmatprep.mubr.bf16.mxu1 %v487_v28 }
 0x179   : > { %v464_v41 = vadd.f32 %v914_v39, %v826_v40  ;;  %v455_v42 = vpop.f32.mrb[15].mxu0  ;;  %940 = vmatmul.mubr.bf16.gmra.mrb[8].mxu1 %v488_v27  ;;  %v481_v44 = vmax.f32 %v461_v34, 0.0 }
 0x17a   : > { %v456_v43 = vadd.f32 %v826_v40, %v455_v42  ;;  %v479_v46 = vmax.f32 %v453_v38, 0.0 }
 0x17b   : > { %v482_v45 = vmax.f32 %v464_v41, 0.0 }
 0x17c   : > { %v480_v47 = vmax.f32 %v456_v43, 0.0 }
 0x17d   : > { %v490_v48 = vpack.c.bf16 %v482_v45, %v481_v44 }
 0x17e   : > { %v489_v49 = vpack.c.bf16 %v480_v47, %v479_v46 }
 0x180   : > { %943 = vmatprep.mubr.bf16.mxu1 %v489_v49 }
 0x181   : > { %944 = vmatmul.mubr.bf16.gmra.mrb[12].mxu1 %v490_v48 }
 0x23c   : > { %v933_v51 = vpop.f32.mrb[0].mxu1 }
 0x23d   : > { %v605_v52 = vadd.f32 %v933_v51, %v1492_v50  ;;  %v596_v53 = vpop.f32.mrb[1].mxu1 }
 0x23e   : > { %v597_v40 = vadd.f32 %v1492_v50, %v596_v53  ;;  %v934_v54 = vpop.f32.mrb[2].mxu1 }
 0x23f   : > { %v661_v55 = vadd.f32 %v605_v52, %v1431_v16  ;;  %v608_v56 = vadd.f32 %v934_v54, %v1492_v50  ;;  %v599_v57 = vpop.f32.mrb[3].mxu1 }
 0x240   : > { %v659_v58 = vadd.f32 %v597_v40, %v1423_v4  ;;  %v600_v59 = vadd.f32 %v1492_v50, %v599_v57 }
 0x241   : > { %v677_v60 = vmax.f32 %v661_v55, 0.0  ;;  %v662_v61 = vadd.f32 %v608_v56, %v1434_v17 }
 0x242   : > { %v675_v62 = vmax.f32 %v659_v58, 0.0  ;;  %v660_v63 = vadd.f32 %v600_v59, %v1426_v5 }
 0x243   : > { %693 = vst [vmem:[%s1504_s11 + $0x10] sm:$0xff] %v677_v60  ;;  %v678_v16 = vmax.f32 %v662_v61, 0.0 }
 0x244   : > { %691 = vst [vmem:[%s1504_s11] sm:$0xff] %v675_v62  ;;  %v676_v0 = vmax.f32 %v660_v63, 0.0  ;;  %v937_v4 = vpop.f32.mrb[4].mxu1 }
 0x245   : > { %694 = vst [vmem:[%s1504_s11 + $0x18] sm:$0xff] %v678_v16  ;;  %v621_v1 = vadd.f32 %v937_v4, %v1492_v50  ;;  %v612_v17 = vpop.f32.mrb[5].mxu1 }
 0x246   : > { %692 = vst [vmem:[%s1504_s11 + $0x8] sm:$0xff] %v676_v0  ;;  %v613_v5 = vadd.f32 %v1492_v50, %v612_v17  ;;  %v938_v2 = vpop.f32.mrb[6].mxu1 }
 0x247   : > { %v665_v3 = vadd.f32 %v621_v1, %v1447_v23  ;;  %v624_v6 = vadd.f32 %v938_v2, %v1492_v50  ;;  %v615_v7 = vpop.f32.mrb[7].mxu1 }
 0x248   : > { %v663_v8 = vadd.f32 %v613_v5, %v1437_v18  ;;  %v616_v9 = vadd.f32 %v1492_v50, %v615_v7 }
 0x249   : > { %v681_v10 = vmax.f32 %v665_v3, 0.0  ;;  %v666_v11 = vadd.f32 %v624_v6, %v1450_v24 }
 0x24a   : > { %v679_v12 = vmax.f32 %v663_v8, 0.0  ;;  %v664_v13 = vadd.f32 %v616_v9, %v1440_v19 }
 0x24b   : > { %697 = vst [vmem:[%s1504_s11 + $0x30] sm:$0xff] %v681_v10  ;;  %v682_v14 = vmax.f32 %v666_v11, 0.0 }
 0x24c   : > { %695 = vst [vmem:[%s1504_s11 + $0x20] sm:$0xff] %v679_v12  ;;  %v680_v15 = vmax.f32 %v664_v13, 0.0  ;;  %v941_v20 = vpop.f32.mrb[8].mxu1 }
 0x24d   : > { %698 = vst [vmem:[%s1504_s11 + $0x38] sm:$0xff] %v682_v14  ;;  %v637_v23 = vadd.f32 %v941_v20, %v1492_v50  ;;  %v628_v21 = vpop.f32.mrb[9].mxu1 }
 0x24e   : > { %696 = vst [vmem:[%s1504_s11 + $0x28] sm:$0xff] %v680_v15  ;;  %v629_v18 = vadd.f32 %v1492_v50, %v628_v21  ;;  %v942_v22 = vpop.f32.mrb[10].mxu1 }
 0x24f   : > { %v669_v24 = vadd.f32 %v637_v23, %v1463_v29  ;;  %v640_v19 = vadd.f32 %v942_v22, %v1492_v50  ;;  %v631_v27 = vpop.f32.mrb[11].mxu1 }
 0x250   : > { %v667_v28 = vadd.f32 %v629_v18, %v1453_v25  ;;  %v632_v33 = vadd.f32 %v1492_v50, %v631_v27 }
 0x251   : > { %v685_v34 = vmax.f32 %v669_v24, 0.0  ;;  %v670_v37 = vadd.f32 %v640_v19, %v1466_v30 }
 0x252   : > { %v683_v38 = vmax.f32 %v667_v28, 0.0  ;;  %v668_v39 = vadd.f32 %v632_v33, %v1456_v26 }
 0x253   : > { %701 = vst [vmem:[%s1504_s11 + $0x50] sm:$0xff] %v685_v34  ;;  %v686_v41 = vmax.f32 %v670_v37, 0.0 }
 0x254   : > { %699 = vst [vmem:[%s1504_s11 + $0x40] sm:$0xff] %v683_v38  ;;  %v684_v29 = vmax.f32 %v668_v39, 0.0  ;;  %v945_v42 = vpop.f32.mrb[12].mxu1 }
 0x255   : > { %702 = vst [vmem:[%s1504_s11 + $0x58] sm:$0xff] %v686_v41  ;;  %v653_v43 = vadd.f32 %v945_v42, %v1492_v50  ;;  %v644_v25 = vpop.f32.mrb[13].mxu1 }
 0x256   : > { %700 = vst [vmem:[%s1504_s11 + $0x48] sm:$0xff] %v684_v29  ;;  %v645_v44 = vadd.f32 %v1492_v50, %v644_v25  ;;  %v946_v45 = vpop.f32.mrb[14].mxu1 }
 0x257   : > { %v673_v30 = vadd.f32 %v653_v43, %v1479_v35  ;;  %v656_v26 = vadd.f32 %v946_v45, %v1492_v50  ;;  %v647_v46 = vpop.f32.mrb[15].mxu1 }
 0x258   : > { %v671_v47 = vadd.f32 %v645_v44, %v1469_v31  ;;  %v648_v48 = vadd.f32 %v1492_v50, %v647_v46 }
 0x259   : > { %v689_v49 = vmax.f32 %v673_v30, 0.0  ;;  %v674_v51 = vadd.f32 %v656_v26, %v1482_v36 }
 0x25a   : > { %v687_v52 = vmax.f32 %v671_v47, 0.0  ;;  %v672_v53 = vadd.f32 %v648_v48, %v1472_v32 }
 0x25b   : > { %705 = vst [vmem:[%s1504_s11 + $0x70] sm:$0xff] %v689_v49  ;;  %v690_v35 = vmax.f32 %v674_v51, 0.0 }
 0x25c   : > { %703 = vst [vmem:[%s1504_s11 + $0x60] sm:$0xff] %v687_v52  ;;  %v688_v31 = vmax.f32 %v672_v53, 0.0 }
 0x25d   : > { %706 = vst [vmem:[%s1504_s11 + $0x78] sm:$0xff] %v690_v35 }
 0x25e   : > { %704 = vst [vmem:[%s1504_s11 + $0x68] sm:$0xff] %v688_v31 }
 0x25f   : > { %1135 = shalt.err (!%p1132_p2)
}
 0x260   : > { %s1136_s6 = scalar_lea.hbm %s1548_s9, 2048  ;;  %s1140_s8 = scalar_lea.hbm %s1602_s5, 4096 }
 0x261   : > { %p1137_p13 = scmp.ne.s32.totalorder %s1548_s9, %s1136_s6  ;;  %p1141_p4 = scmp.lt.u32.totalorder %s1548_s9, %s1602_s5 }
 0x262   : > { %p1142_p5 = scmp.lt.u32.totalorder %s1140_s8, %s1136_s6  ;;  %p1144_p11 = scmp.lt.u32.totalorder %s1136_s6, %s1548_s9 }
 0x263   : > { %p1138_p6 = pnand %p1137_p13, %p1616_p0 }
 0x264   : > { %p1143_p8 = por %p1142_p5, %p1141_p4 }
 0x265   : > { %p1139_p10 = pneg %p1138_p6 }
 0x266   : > { %p1145_p1 = por %p1144_p11, %p1143_p8 }
 0x268   : > { %p1146_p3 = pnand %p1145_p1, %p1139_p10 }
 0x26a   : > { %1149 = shalt.err (!%p1146_p3)
}
 0x26b   : > { %s1202_s28 = smov 128   ;;  %s1203_s15 = smov 8  }
 0x26c   : > { %957 = dma.vmem_to_hbm [thread:$0]  (%p1616_p0), %s1550_s30, 2048, %s1548_s9, %s708_s22, %s1202_s28, %s1202_s28, %s1203_s15  }
 0x26d PF: > { %s736_s16 = sand.u32 1, %s1180_s18   ;;  %p1617_p7 = scmp.ne.s32.totalorder %s1607_s25, 0 }
 0x26e   : > { %p1618_p9 = scmp.ge.s32.totalorder %s1192_s21, 2  ;;  %s737_s12 = scalar_lea.sflag [#allocation4], %s736_s16 }
 0x270   : > { %p971_p12 = pnand %p1618_p9, %p1617_p7 }
 0x272   : > { %1175 = dma.done.wait (!%p971_p12), %s737_s12, 2048  }
 0x273   : > { %1177 = vsyncadd (!%p971_p12), %s737_s12, 4294965248  ;;  %p19_p2 = scmp.ge.s32.totalorder %s1344_s14, 4   ;;  %s1619_s18 = smov %s1184_s19 }
 0x274   : > { %s1620_s19 = smov %s1188_s20  ;;  %s1621_s20 = smov %s1360_s27 }
 0x275   : > { %s1622_s21 = smov %s1344_s14  ;;  %21 = sbr.rel (!%p19_p2) target bundleno = 6 (0x6), region = 93 }
 0x27c   :  { %742 = vsyncpa [#allocation3], 1 }
 0x27d   :  { %744 = vsyncpa [#allocation3 + $0x1], 1 }
 0x27e   :  { %745 = vsyncpa [#allocation6], 1 }
 0x27f   :  { %746 = vsyncpa [#allocation4], 1 }
 0x280   :  { %748 = vsyncpa [#allocation4 + $0x1], 1 }

</bundles_post_ra>
